<compile_context>
chip_gen: v5e
topology: v5e:2x2
jax: 0.10.0
libtpu: 0.0.40
codegen_flags: <defaults>
</compile_context>

<pallas_src>
import functools

import jax
import jax.numpy as jnp
from jax import lax
from jax.experimental import pallas as pl
from jax.experimental.pallas import tpu as pltpu


def _layer_norm(x, gamma, beta, eps):
    mean = jnp.mean(x, axis=-1, keepdims=True)
    xc = x - mean
    var = jnp.mean(xc * xc, axis=-1, keepdims=True)
    return xc * lax.rsqrt(var + eps) * gamma + beta


def _encoder_block_kernel(
    xq_ref,     # (1, TQ, D) f32  query / residual-stream tile
    xf_ref,     # (1, S,  D) f32  full sequence (key/value source)
    wqkv_ref,   # (D, 3D)  compute_dtype  fused qkv weight (Q cols pre-scaled)
    bqkv_ref,   # (1, 3D)  f32            fused qkv bias   (Q part pre-scaled)
    wo_ref,     # (D, D)   compute_dtype  out_proj weight
    bo_ref,     # (1, D)   f32            out_proj bias
    g1_ref,     # (1, D)   f32            LayerNorm1 gamma
    be1_ref,    # (1, D)   f32            LayerNorm1 beta
    w1_ref,     # (D, F)   compute_dtype  FFN linear1 weight
    b1_ref,     # (1, F)   f32            FFN linear1 bias
    w2_ref,     # (F, D)   compute_dtype  FFN linear2 weight
    b2_ref,     # (1, D)   f32            FFN linear2 bias
    g2_ref,     # (1, D)   f32            LayerNorm2 gamma
    be2_ref,    # (1, D)   f32            LayerNorm2 beta
    o_ref,      # (1, TQ, D) f32
    *,
    num_heads: int,
    head_dim: int,
    d_model: int,
    eps: float,
    compute_dtype,
):
    cd = compute_dtype
    D = d_model
    hd = head_dim

    xq = xq_ref[0]                       # [TQ, D] f32
    xf = xf_ref[0]                       # [S,  D] f32
    xq_c = xq.astype(cd)
    xf_c = xf.astype(cd)

    # ---- fused, lane-dense projections (score scale folded into Q cols) ----
    q_all = jnp.dot(xq_c, wqkv_ref[:, :D],
                    preferred_element_type=jnp.float32) + bqkv_ref[:, :D]   # [TQ, D]
    kv_all = jnp.dot(xf_c, wqkv_ref[:, D:],
                     preferred_element_type=jnp.float32) + bqkv_ref[:, D:]  # [S, 2D]

    # ---- multi-head self-attention (mask=None; attn dropout = identity) ----
    attn_acc = jnp.zeros((xq.shape[0], D), jnp.float32)
    for h in range(num_heads):           # static -> unrolled at trace time
        q_h = q_all[:, h * hd:(h + 1) * hd].astype(cd)            # [TQ, hd]
        k_h = kv_all[:, h * hd:(h + 1) * hd].astype(cd)           # [S,  hd]
        v_h = kv_all[:, D + h * hd:D + (h + 1) * hd].astype(cd)   # [S,  hd]

        # q @ k^T: contract last dims directly (no .T / XLU transpose).
        scores = lax.dot_general(q_h, k_h, (((1,), (1,)), ((), ())),
                                 preferred_element_type=jnp.float32)  # [TQ, S]
        scores = scores - jnp.max(scores, axis=-1, keepdims=True)
        p = jnp.exp(scores)
        attn = p * pl.reciprocal(jnp.sum(p, axis=-1, keepdims=True),
                                 approx=True)                         # softmax, f32

        ctx_h = jnp.dot(attn.astype(cd), v_h,
                        preferred_element_type=jnp.float32)           # [TQ, hd]
        # Per-head out-projection accumulation (lane-dense N = D output);
        # replaces the concatenate-then-project pattern.
        attn_acc = attn_acc + jnp.dot(
            ctx_h.astype(cd), wo_ref[h * hd:(h + 1) * hd, :],
            preferred_element_type=jnp.float32)

    attn_out = attn_acc + bo_ref[...]

    # ---- residual + LayerNorm1 (dropout = identity) ----
    h1 = _layer_norm(xq + attn_out, g1_ref[...], be1_ref[...], eps)

    # ---- feed-forward: linear1 -> GELU -> linear2 ----
    ffh = jnp.dot(h1.astype(cd), w1_ref[...],
                  preferred_element_type=jnp.float32) + b1_ref[...]
    ffh = jax.nn.gelu(ffh, approximate=True)   # tanh approx (see TODO)
    ff = jnp.dot(ffh.astype(cd), w2_ref[...],
                 preferred_element_type=jnp.float32) + b2_ref[...]

    # ---- residual + LayerNorm2 ----
    out = _layer_norm(h1 + ff, g2_ref[...], be2_ref[...], eps)
    o_ref[0] = out.astype(o_ref.dtype)


def _choose_q_tile(seq_len):
    """Largest query tile that evenly divides S (tile whole S when small)."""
    if seq_len <= 512:
        return seq_len
    for cand in (512, 256, 128, 64, 32, 16, 8):
        if seq_len % cand == 0:
            return cand
    return seq_len


def encoder_block(x, params, *, num_heads, d_ff, eps=1e-5,
                  compute_dtype=jnp.float32):
    """x: [B, S, D] float32. params: dict from init_params (PyTorch layout)."""
    B, S, D = x.shape
    assert D % num_heads == 0, "d_model must be divisible by num_heads"
    hd = D // num_heads
    F = d_ff
    tq = _choose_q_tile(S)
    n_qt = S // tq

    # Fold the 1/sqrt(head_dim) score scale into the Q projection (free: weights
    # are constants), and cast matmul weight matrices ONCE to the MXU operand
    # dtype.  Biases and LayerNorm params stay f32 (non-matmul math is f32 on
    # all chips, including v5e which has no bf16 VPU).  In production these
    # would be pre-cast at init rather than per call.
    scale = hd ** -0.5
    col_scale = jnp.concatenate(
        [jnp.full((D,), scale, jnp.float32), jnp.ones((2 * D,), jnp.float32)])
    wqkv = (params["wqkv"] * col_scale[None, :]).astype(compute_dtype)
    bqkv = (params["bqkv"] * col_scale[None, :]).astype(jnp.float32)
    wo = params["wo"].astype(compute_dtype)
    w1 = params["w1"].astype(compute_dtype)
    w2 = params["w2"].astype(compute_dtype)

    # VMEM budget: single-buffered weights + double-buffered x/o tiles +
    # in-kernel temporaries; capped at 64 MiB so it stays legal on v7x.
    w_item = jnp.dtype(compute_dtype).itemsize
    weight_bytes = (D * 3 * D + D * D + D * F + F * D) * w_item
    act_bytes = (2 * tq * D + 2 * S * D + 2 * tq * D) * 4
    tmp_bytes = (tq * 3 * D + S * 2 * D + tq * S + tq * F) * 4
    vmem_limit = int(min(64 * 1024 * 1024,
                         max(32 * 1024 * 1024,
                             1.3 * (weight_bytes + act_bytes + tmp_bytes))))

    kernel = functools.partial(
        _encoder_block_kernel,
        num_heads=num_heads, head_dim=hd, d_model=D, eps=eps,
        compute_dtype=compute_dtype)

    # Whole-array VMEM residency for parameters: not part of the per-grid-step
    # pipeline, so they are single-buffered and DMA'd once.
    vmem_full = pl.BlockSpec(memory_space=pltpu.MemorySpace.VMEM)

    return pl.pallas_call(
        kernel,
        out_shape=jax.ShapeDtypeStruct((B, S, D), jnp.float32),
        grid_spec=pltpu.PrefetchScalarGridSpec(
            num_scalar_prefetch=0,
            grid=(B, n_qt),
            in_specs=[
                pl.BlockSpec((1, tq, D), lambda b, t: (b, t, 0)),   # x (q/residual tile)
                pl.BlockSpec((1, S, D), lambda b, t: (b, 0, 0)),    # x (full, K/V source)
                vmem_full,   # wqkv
                vmem_full,   # bqkv
                vmem_full,   # wo
                vmem_full,   # bo
                vmem_full,   # ln1 gamma
                vmem_full,   # ln1 beta
                vmem_full,   # w1
                vmem_full,   # b1
                vmem_full,   # w2
                vmem_full,   # b2
                vmem_full,   # ln2 gamma
                vmem_full,   # ln2 beta
            ],
            out_specs=pl.BlockSpec((1, tq, D), lambda b, t: (b, t, 0)),
        ),
        compiler_params=pltpu.CompilerParams(
            dimension_semantics=("parallel", "parallel"),
            vmem_limit_bytes=vmem_limit,
        ),
    )(x, x, wqkv, bqkv, wo, params["bo"], params["ln1_g"], params["ln1_b"],
      w1, params["b1"], w2, params["b2"], params["ln2_g"], params["ln2_b"])


def init_params(key, d_model, num_heads, d_ff):
    """PyTorch-Linear-style init: U(-1/sqrt(fan_in), 1/sqrt(fan_in)).

    wqkv is [D, 3D] with columns ordered (component, head, dim) — exactly the
    chunking PyTorch's reshape(B, S, 3, H, head_dim) of the fused qkv_proj
    output performs.  All weights [in_features, out_features].
    """
    D, F = d_model, d_ff
    ks = jax.random.split(key, 8)

    def u(k, shape, fan_in):
        bound = 1.0 / (fan_in ** 0.5)
        return jax.random.uniform(k, shape, jnp.float32, -bound, bound)

    return {
        "wqkv": u(ks[0], (D, 3 * D), D),
        "bqkv": u(ks[1], (1, 3 * D), D),
        "wo":   u(ks[2], (D, D), D),
        "bo":   u(ks[3], (1, D), D),
        "ln1_g": jnp.ones((1, D), jnp.float32),
        "ln1_b": jnp.zeros((1, D), jnp.float32),
        "w1":   u(ks[4], (D, F), D),
        "b1":   u(ks[5], (1, F), D),
        "w2":   u(ks[6], (F, D), F),
        "b2":   u(ks[7], (1, D), F),
        "ln2_g": jnp.ones((1, D), jnp.float32),
        "ln2_b": jnp.zeros((1, D), jnp.float32),
    }


def reference_forward(x, p, *, num_heads, eps=1e-5):
    """Pure-JAX reference mirroring the PyTorch forward (eval mode, mask=None)."""
    B, S, D = x.shape
    hd = D // num_heads
    scale = hd ** -0.5

    def ln(v, g, b):
        m = jnp.mean(v, axis=-1, keepdims=True)
        c = v - m
        var = jnp.mean(c * c, axis=-1, keepdims=True)
        return c * lax.rsqrt(var + eps) * g + b

    qkv = x @ p["wqkv"] + p["bqkv"]
    q, k, v = jnp.split(qkv, 3, axis=-1)
    q = q.reshape(B, S, num_heads, hd)
    k = k.reshape(B, S, num_heads, hd)
    v = v.reshape(B, S, num_heads, hd)
    s = jnp.einsum("bqhd,bkhd->bhqk", q, k) * scale
    a = jax.nn.softmax(s, axis=-1)
    ctx = jnp.einsum("bhqk,bkhd->bqhd", a, v).reshape(B, S, D)
    attn_out = ctx @ p["wo"] + p["bo"]

    h1 = ln(x + attn_out, p["ln1_g"], p["ln1_b"])
    ff = jax.nn.gelu(h1 @ p["w1"] + p["b1"], approximate=True)
    ff = ff @ p["w2"] + p["b2"]
    return ln(h1 + ff, p["ln2_g"], p["ln2_b"])


if __name__ == "__main__":
    # Small shapes consistent with the module's forward.
    # NOTE: at D=32 / S=8 every vreg runs at low lane utilization; these sizes
    # exercise correctness, not performance (tune with D, S multiples of 128/8).
    B, S, d_model, num_heads, d_ff = 2, 8, 32, 4, 64

    key = jax.random.PRNGKey(0)
    k_param, k_x = jax.random.split(key)
    params = init_params(k_param, d_model, num_heads, d_ff)
    x = jax.random.normal(k_x, (B, S, d_model), jnp.float32)

    ref = reference_forward(x, params, num_heads=num_heads)

    # f32 MXU-operand path: tight parity with the reference (the 2e-3 tolerance
    # covers the EUP approximate reciprocal in the in-kernel softmax).
    out = encoder_block(x, params, num_heads=num_heads, d_ff=d_ff,
                        compute_dtype=jnp.float32)
    out = jax.block_until_ready(out)
    assert out.shape == (B, S, d_model)
    assert jnp.allclose(out, ref, rtol=2e-3, atol=2e-3), "f32 path mismatch vs reference"

    # bf16 MXU-operand path (recommended for v6e/v7x): weights stored bf16,
    # f32 accumulation, all non-matmul math f32; looser tolerance for bf16
    # operand rounding.
    out_bf16 = encoder_block(x, params, num_heads=num_heads, d_ff=d_ff,
                             compute_dtype=jnp.bfloat16)
    out_bf16 = jax.block_until_ready(out_bf16)
    assert jnp.allclose(out_bf16, ref, rtol=1e-1, atol=1e-1), "bf16 path mismatch vs reference"

    print("KERNEL_OK")
</pallas_src>

<mosaic_0001>
module attributes {stable_mosaic.version = 11 : i64} {
  func.func @_encoder_block_kernel(%arg0: i32, %arg1: i32, %arg2: memref<1x8x32xf32, #tpu.memory_space<vmem>>, %arg3: memref<1x8x32xf32, #tpu.memory_space<vmem>>, %arg4: memref<32x96xf32, #tpu.memory_space<vmem>>, %arg5: memref<1x96xf32, #tpu.memory_space<vmem>>, %arg6: memref<32x32xf32, #tpu.memory_space<vmem>>, %arg7: memref<1x32xf32, #tpu.memory_space<vmem>>, %arg8: memref<1x32xf32, #tpu.memory_space<vmem>>, %arg9: memref<1x32xf32, #tpu.memory_space<vmem>>, %arg10: memref<32x64xf32, #tpu.memory_space<vmem>>, %arg11: memref<1x64xf32, #tpu.memory_space<vmem>>, %arg12: memref<64x32xf32, #tpu.memory_space<vmem>>, %arg13: memref<1x32xf32, #tpu.memory_space<vmem>>, %arg14: memref<1x32xf32, #tpu.memory_space<vmem>>, %arg15: memref<1x32xf32, #tpu.memory_space<vmem>>, %arg16: memref<1x8x32xf32, #tpu.memory_space<vmem>>) attributes {dimension_semantics = [#tpu.dimension_semantics<parallel>, #tpu.dimension_semantics<parallel>], iteration_bounds = array<i64: 2, 1>, scalar_prefetch = 0 : i64, scratch_operands = 0 : i64, tpu.core_type = #tpu.core_type<tc>, window_params = [{transform_indices = @transform_0, window_bounds = array<i64: 1, 8, 32>}, {transform_indices = @transform_1, window_bounds = array<i64: 1, 8, 32>}, {pipeline_mode = #tpu.pipeline_mode<synchronous>, transform_indices = @transform_2, window_bounds = array<i64: 32, 96>}, {pipeline_mode = #tpu.pipeline_mode<synchronous>, transform_indices = @transform_3, window_bounds = array<i64: 1, 96>}, {pipeline_mode = #tpu.pipeline_mode<synchronous>, transform_indices = @transform_4, window_bounds = array<i64: 32, 32>}, {pipeline_mode = #tpu.pipeline_mode<synchronous>, transform_indices = @transform_5, window_bounds = array<i64: 1, 32>}, {pipeline_mode = #tpu.pipeline_mode<synchronous>, transform_indices = @transform_6, window_bounds = array<i64: 1, 32>}, {pipeline_mode = #tpu.pipeline_mode<synchronous>, transform_indices = @transform_7, window_bounds = array<i64: 1, 32>}, {pipeline_mode = #tpu.pipeline_mode<synchronous>, transform_indices = @transform_8, window_bounds = array<i64: 32, 64>}, {pipeline_mode = #tpu.pipeline_mode<synchronous>, transform_indices = @transform_9, window_bounds = array<i64: 1, 64>}, {pipeline_mode = #tpu.pipeline_mode<synchronous>, transform_indices = @transform_10, window_bounds = array<i64: 64, 32>}, {pipeline_mode = #tpu.pipeline_mode<synchronous>, transform_indices = @transform_11, window_bounds = array<i64: 1, 32>}, {pipeline_mode = #tpu.pipeline_mode<synchronous>, transform_indices = @transform_12, window_bounds = array<i64: 1, 32>}, {pipeline_mode = #tpu.pipeline_mode<synchronous>, transform_indices = @transform_13, window_bounds = array<i64: 1, 32>}, {transform_indices = @transform_14, window_bounds = array<i64: 1, 8, 32>}]} {
    %c0 = arith.constant 0 : index
    %c0_0 = arith.constant 0 : index
    %c0_1 = arith.constant 0 : index
    %0 = vector.load %arg2[%c0, %c0_0, %c0_1] : memref<1x8x32xf32, #tpu.memory_space<vmem>>, vector<1x8x32xf32>
    %1 = vector.shape_cast %0 : vector<1x8x32xf32> to vector<8x32xf32>
    %c0_2 = arith.constant 0 : index
    %c0_3 = arith.constant 0 : index
    %c0_4 = arith.constant 0 : index
    %2 = vector.load %arg3[%c0_2, %c0_3, %c0_4] : memref<1x8x32xf32, #tpu.memory_space<vmem>>, vector<1x8x32xf32>
    %3 = vector.shape_cast %2 : vector<1x8x32xf32> to vector<8x32xf32>
    %c0_5 = arith.constant 0 : index
    %c0_6 = arith.constant 0 : index
    %4 = vector.load %arg4[%c0_5, %c0_6] : memref<32x96xf32, #tpu.memory_space<vmem>>, vector<32x32xf32>
    %cst = arith.constant dense<0.000000e+00> : vector<8x32xf32>
    %5 = tpu.matmul %1, %4, %cst {dimension_numbers = #tpu.dot_dimension_numbers<[1], [0], [0], [1], [0, 0, 1, 1], [], []>} : vector<8x32xf32>, vector<32x32xf32>, vector<8x32xf32> -> vector<8x32xf32>
    %c0_7 = arith.constant 0 : index
    %c0_8 = arith.constant 0 : index
    %6 = vector.load %arg5[%c0_7, %c0_8] : memref<1x96xf32, #tpu.memory_space<vmem>>, vector<1x32xf32>
    %7 = vector.broadcast %6 : vector<1x32xf32> to vector<8x32xf32>
    %8 = arith.addf %5, %7 : vector<8x32xf32>
    %c0_9 = arith.constant 0 : index
    %c32 = arith.constant 32 : index
    %9 = vector.load %arg4[%c0_9, %c32] : memref<32x96xf32, #tpu.memory_space<vmem>>, vector<32x64xf32>
    %cst_10 = arith.constant dense<0.000000e+00> : vector<8x64xf32>
    %10 = tpu.matmul %3, %9, %cst_10 {dimension_numbers = #tpu.dot_dimension_numbers<[1], [0], [0], [1], [0, 0, 1, 1], [], []>} : vector<8x32xf32>, vector<32x64xf32>, vector<8x64xf32> -> vector<8x64xf32>
    %c0_11 = arith.constant 0 : index
    %c32_12 = arith.constant 32 : index
    %11 = vector.load %arg5[%c0_11, %c32_12] : memref<1x96xf32, #tpu.memory_space<vmem>>, vector<1x64xf32>
    %12 = vector.broadcast %11 : vector<1x64xf32> to vector<8x64xf32>
    %13 = arith.addf %10, %12 : vector<8x64xf32>
    %cst_13 = arith.constant 0.000000e+00 : f32
    %14 = vector.broadcast %cst_13 : f32 to vector<8x32xf32>
    %15 = vector.extract_strided_slice %8 {offsets = [0, 0], sizes = [8, 8], strides = [1, 1]} : vector<8x32xf32> to vector<8x8xf32>
    %16 = vector.extract_strided_slice %13 {offsets = [0, 0], sizes = [8, 8], strides = [1, 1]} : vector<8x64xf32> to vector<8x8xf32>
    %17 = vector.extract_strided_slice %13 {offsets = [0, 32], sizes = [8, 8], strides = [1, 1]} : vector<8x64xf32> to vector<8x8xf32>
    %cst_14 = arith.constant dense<0.000000e+00> : vector<8x8xf32>
    %18 = tpu.matmul %15, %16, %cst_14 {dimension_numbers = #tpu.dot_dimension_numbers<[1], [1], [0], [0], [0, 0, 1, 0], [], []>} : vector<8x8xf32>, vector<8x8xf32>, vector<8x8xf32> -> vector<8x8xf32>
    %cst_15 = arith.constant dense<0xFF800000> : vector<8xf32>
    %19 = vector.multi_reduction <maximumf>, %18, %cst_15 [1] : vector<8x8xf32> to vector<8xf32>
    %20 = vector.shape_cast %19 : vector<8xf32> to vector<8x1xf32>
    %21 = vector.broadcast %20 : vector<8x1xf32> to vector<8x8xf32>
    %22 = arith.subf %18, %21 : vector<8x8xf32>
    %23 = math.exp %22 : vector<8x8xf32>
    %cst_16 = arith.constant dense<0.000000e+00> : vector<8xf32>
    %24 = vector.multi_reduction <add>, %23, %cst_16 [1] : vector<8x8xf32> to vector<8xf32>
    %25 = vector.shape_cast %24 : vector<8xf32> to vector<8x1xf32>
    %26 = tpu.reciprocal %25 {approx = true} : vector<8x1xf32> -> vector<8x1xf32>
    %27 = vector.broadcast %26 : vector<8x1xf32> to vector<8x8xf32>
    %28 = arith.mulf %23, %27 : vector<8x8xf32>
    %cst_17 = arith.constant dense<0.000000e+00> : vector<8x8xf32>
    %29 = tpu.matmul %28, %17, %cst_17 {dimension_numbers = #tpu.dot_dimension_numbers<[1], [0], [0], [1], [0, 0, 1, 1], [], []>} : vector<8x8xf32>, vector<8x8xf32>, vector<8x8xf32> -> vector<8x8xf32>
    %c0_18 = arith.constant 0 : index
    %c0_19 = arith.constant 0 : index
    %30 = vector.load %arg6[%c0_18, %c0_19] : memref<32x32xf32, #tpu.memory_space<vmem>>, vector<8x32xf32>
    %cst_20 = arith.constant dense<0.000000e+00> : vector<8x32xf32>
    %31 = tpu.matmul %29, %30, %cst_20 {dimension_numbers = #tpu.dot_dimension_numbers<[1], [0], [0], [1], [0, 0, 1, 1], [], []>} : vector<8x8xf32>, vector<8x32xf32>, vector<8x32xf32> -> vector<8x32xf32>
    %32 = arith.addf %14, %31 : vector<8x32xf32>
    %33 = vector.extract_strided_slice %8 {offsets = [0, 8], sizes = [8, 8], strides = [1, 1]} : vector<8x32xf32> to vector<8x8xf32>
    %34 = vector.extract_strided_slice %13 {offsets = [0, 8], sizes = [8, 8], strides = [1, 1]} : vector<8x64xf32> to vector<8x8xf32>
    %35 = vector.extract_strided_slice %13 {offsets = [0, 40], sizes = [8, 8], strides = [1, 1]} : vector<8x64xf32> to vector<8x8xf32>
    %cst_21 = arith.constant dense<0.000000e+00> : vector<8x8xf32>
    %36 = tpu.matmul %33, %34, %cst_21 {dimension_numbers = #tpu.dot_dimension_numbers<[1], [1], [0], [0], [0, 0, 1, 0], [], []>} : vector<8x8xf32>, vector<8x8xf32>, vector<8x8xf32> -> vector<8x8xf32>
    %cst_22 = arith.constant dense<0xFF800000> : vector<8xf32>
    %37 = vector.multi_reduction <maximumf>, %36, %cst_22 [1] : vector<8x8xf32> to vector<8xf32>
    %38 = vector.shape_cast %37 : vector<8xf32> to vector<8x1xf32>
    %39 = vector.broadcast %38 : vector<8x1xf32> to vector<8x8xf32>
    %40 = arith.subf %36, %39 : vector<8x8xf32>
    %41 = math.exp %40 : vector<8x8xf32>
    %cst_23 = arith.constant dense<0.000000e+00> : vector<8xf32>
    %42 = vector.multi_reduction <add>, %41, %cst_23 [1] : vector<8x8xf32> to vector<8xf32>
    %43 = vector.shape_cast %42 : vector<8xf32> to vector<8x1xf32>
    %44 = tpu.reciprocal %43 {approx = true} : vector<8x1xf32> -> vector<8x1xf32>
    %45 = vector.broadcast %44 : vector<8x1xf32> to vector<8x8xf32>
    %46 = arith.mulf %41, %45 : vector<8x8xf32>
    %cst_24 = arith.constant dense<0.000000e+00> : vector<8x8xf32>
    %47 = tpu.matmul %46, %35, %cst_24 {dimension_numbers = #tpu.dot_dimension_numbers<[1], [0], [0], [1], [0, 0, 1, 1], [], []>} : vector<8x8xf32>, vector<8x8xf32>, vector<8x8xf32> -> vector<8x8xf32>
    %c8 = arith.constant 8 : index
    %c0_25 = arith.constant 0 : index
    %48 = vector.load %arg6[%c8, %c0_25] : memref<32x32xf32, #tpu.memory_space<vmem>>, vector<8x32xf32>
    %cst_26 = arith.constant dense<0.000000e+00> : vector<8x32xf32>
    %49 = tpu.matmul %47, %48, %cst_26 {dimension_numbers = #tpu.dot_dimension_numbers<[1], [0], [0], [1], [0, 0, 1, 1], [], []>} : vector<8x8xf32>, vector<8x32xf32>, vector<8x32xf32> -> vector<8x32xf32>
    %50 = arith.addf %32, %49 : vector<8x32xf32>
    %51 = vector.extract_strided_slice %8 {offsets = [0, 16], sizes = [8, 8], strides = [1, 1]} : vector<8x32xf32> to vector<8x8xf32>
    %52 = vector.extract_strided_slice %13 {offsets = [0, 16], sizes = [8, 8], strides = [1, 1]} : vector<8x64xf32> to vector<8x8xf32>
    %53 = vector.extract_strided_slice %13 {offsets = [0, 48], sizes = [8, 8], strides = [1, 1]} : vector<8x64xf32> to vector<8x8xf32>
    %cst_27 = arith.constant dense<0.000000e+00> : vector<8x8xf32>
    %54 = tpu.matmul %51, %52, %cst_27 {dimension_numbers = #tpu.dot_dimension_numbers<[1], [1], [0], [0], [0, 0, 1, 0], [], []>} : vector<8x8xf32>, vector<8x8xf32>, vector<8x8xf32> -> vector<8x8xf32>
    %cst_28 = arith.constant dense<0xFF800000> : vector<8xf32>
    %55 = vector.multi_reduction <maximumf>, %54, %cst_28 [1] : vector<8x8xf32> to vector<8xf32>
    %56 = vector.shape_cast %55 : vector<8xf32> to vector<8x1xf32>
    %57 = vector.broadcast %56 : vector<8x1xf32> to vector<8x8xf32>
    %58 = arith.subf %54, %57 : vector<8x8xf32>
    %59 = math.exp %58 : vector<8x8xf32>
    %cst_29 = arith.constant dense<0.000000e+00> : vector<8xf32>
    %60 = vector.multi_reduction <add>, %59, %cst_29 [1] : vector<8x8xf32> to vector<8xf32>
    %61 = vector.shape_cast %60 : vector<8xf32> to vector<8x1xf32>
    %62 = tpu.reciprocal %61 {approx = true} : vector<8x1xf32> -> vector<8x1xf32>
    %63 = vector.broadcast %62 : vector<8x1xf32> to vector<8x8xf32>
    %64 = arith.mulf %59, %63 : vector<8x8xf32>
    %cst_30 = arith.constant dense<0.000000e+00> : vector<8x8xf32>
    %65 = tpu.matmul %64, %53, %cst_30 {dimension_numbers = #tpu.dot_dimension_numbers<[1], [0], [0], [1], [0, 0, 1, 1], [], []>} : vector<8x8xf32>, vector<8x8xf32>, vector<8x8xf32> -> vector<8x8xf32>
    %c16 = arith.constant 16 : index
    %c0_31 = arith.constant 0 : index
    %66 = vector.load %arg6[%c16, %c0_31] : memref<32x32xf32, #tpu.memory_space<vmem>>, vector<8x32xf32>
    %cst_32 = arith.constant dense<0.000000e+00> : vector<8x32xf32>
    %67 = tpu.matmul %65, %66, %cst_32 {dimension_numbers = #tpu.dot_dimension_numbers<[1], [0], [0], [1], [0, 0, 1, 1], [], []>} : vector<8x8xf32>, vector<8x32xf32>, vector<8x32xf32> -> vector<8x32xf32>
    %68 = arith.addf %50, %67 : vector<8x32xf32>
    %69 = vector.extract_strided_slice %8 {offsets = [0, 24], sizes = [8, 8], strides = [1, 1]} : vector<8x32xf32> to vector<8x8xf32>
    %70 = vector.extract_strided_slice %13 {offsets = [0, 24], sizes = [8, 8], strides = [1, 1]} : vector<8x64xf32> to vector<8x8xf32>
    %71 = vector.extract_strided_slice %13 {offsets = [0, 56], sizes = [8, 8], strides = [1, 1]} : vector<8x64xf32> to vector<8x8xf32>
    %cst_33 = arith.constant dense<0.000000e+00> : vector<8x8xf32>
    %72 = tpu.matmul %69, %70, %cst_33 {dimension_numbers = #tpu.dot_dimension_numbers<[1], [1], [0], [0], [0, 0, 1, 0], [], []>} : vector<8x8xf32>, vector<8x8xf32>, vector<8x8xf32> -> vector<8x8xf32>
    %cst_34 = arith.constant dense<0xFF800000> : vector<8xf32>
    %73 = vector.multi_reduction <maximumf>, %72, %cst_34 [1] : vector<8x8xf32> to vector<8xf32>
    %74 = vector.shape_cast %73 : vector<8xf32> to vector<8x1xf32>
    %75 = vector.broadcast %74 : vector<8x1xf32> to vector<8x8xf32>
    %76 = arith.subf %72, %75 : vector<8x8xf32>
    %77 = math.exp %76 : vector<8x8xf32>
    %cst_35 = arith.constant dense<0.000000e+00> : vector<8xf32>
    %78 = vector.multi_reduction <add>, %77, %cst_35 [1] : vector<8x8xf32> to vector<8xf32>
    %79 = vector.shape_cast %78 : vector<8xf32> to vector<8x1xf32>
    %80 = tpu.reciprocal %79 {approx = true} : vector<8x1xf32> -> vector<8x1xf32>
    %81 = vector.broadcast %80 : vector<8x1xf32> to vector<8x8xf32>
    %82 = arith.mulf %77, %81 : vector<8x8xf32>
    %cst_36 = arith.constant dense<0.000000e+00> : vector<8x8xf32>
    %83 = tpu.matmul %82, %71, %cst_36 {dimension_numbers = #tpu.dot_dimension_numbers<[1], [0], [0], [1], [0, 0, 1, 1], [], []>} : vector<8x8xf32>, vector<8x8xf32>, vector<8x8xf32> -> vector<8x8xf32>
    %c24 = arith.constant 24 : index
    %c0_37 = arith.constant 0 : index
    %84 = vector.load %arg6[%c24, %c0_37] : memref<32x32xf32, #tpu.memory_space<vmem>>, vector<8x32xf32>
    %cst_38 = arith.constant dense<0.000000e+00> : vector<8x32xf32>
    %85 = tpu.matmul %83, %84, %cst_38 {dimension_numbers = #tpu.dot_dimension_numbers<[1], [0], [0], [1], [0, 0, 1, 1], [], []>} : vector<8x8xf32>, vector<8x32xf32>, vector<8x32xf32> -> vector<8x32xf32>
    %86 = arith.addf %68, %85 : vector<8x32xf32>
    %c0_39 = arith.constant 0 : index
    %c0_40 = arith.constant 0 : index
    %87 = vector.load %arg7[%c0_39, %c0_40] : memref<1x32xf32, #tpu.memory_space<vmem>>, vector<1x32xf32>
    %88 = vector.broadcast %87 : vector<1x32xf32> to vector<8x32xf32>
    %89 = arith.addf %86, %88 : vector<8x32xf32>
    %90 = arith.addf %1, %89 : vector<8x32xf32>
    %c0_41 = arith.constant 0 : index
    %c0_42 = arith.constant 0 : index
    %91 = vector.load %arg8[%c0_41, %c0_42] : memref<1x32xf32, #tpu.memory_space<vmem>>, vector<1x32xf32>
    %c0_43 = arith.constant 0 : index
    %c0_44 = arith.constant 0 : index
    %92 = vector.load %arg9[%c0_43, %c0_44] : memref<1x32xf32, #tpu.memory_space<vmem>>, vector<1x32xf32>
    %cst_45 = arith.constant dense<0.000000e+00> : vector<8xf32>
    %93 = vector.multi_reduction <add>, %90, %cst_45 [1] : vector<8x32xf32> to vector<8xf32>
    %94 = vector.shape_cast %93 : vector<8xf32> to vector<8x1xf32>
    %cst_46 = arith.constant 3.200000e+01 : f32
    %95 = vector.broadcast %cst_46 : f32 to vector<8x1xf32>
    %96 = arith.divf %94, %95 : vector<8x1xf32>
    %97 = vector.broadcast %96 : vector<8x1xf32> to vector<8x32xf32>
    %98 = arith.subf %90, %97 : vector<8x32xf32>
    %99 = arith.mulf %98, %98 : vector<8x32xf32>
    %cst_47 = arith.constant dense<0.000000e+00> : vector<8xf32>
    %100 = vector.multi_reduction <add>, %99, %cst_47 [1] : vector<8x32xf32> to vector<8xf32>
    %101 = vector.shape_cast %100 : vector<8xf32> to vector<8x1xf32>
    %cst_48 = arith.constant 3.200000e+01 : f32
    %102 = vector.broadcast %cst_48 : f32 to vector<8x1xf32>
    %103 = arith.divf %101, %102 : vector<8x1xf32>
    %cst_49 = arith.constant 9.99999974E-6 : f32
    %104 = vector.broadcast %cst_49 : f32 to vector<8x1xf32>
    %105 = arith.addf %103, %104 : vector<8x1xf32>
    %106 = math.rsqrt %105 : vector<8x1xf32>
    %107 = vector.broadcast %106 : vector<8x1xf32> to vector<8x32xf32>
    %108 = arith.mulf %98, %107 : vector<8x32xf32>
    %109 = vector.broadcast %91 : vector<1x32xf32> to vector<8x32xf32>
    %110 = arith.mulf %108, %109 : vector<8x32xf32>
    %111 = vector.broadcast %92 : vector<1x32xf32> to vector<8x32xf32>
    %112 = arith.addf %110, %111 : vector<8x32xf32>
    %c0_50 = arith.constant 0 : index
    %c0_51 = arith.constant 0 : index
    %113 = vector.load %arg10[%c0_50, %c0_51] : memref<32x64xf32, #tpu.memory_space<vmem>>, vector<32x64xf32>
    %cst_52 = arith.constant dense<0.000000e+00> : vector<8x64xf32>
    %114 = tpu.matmul %112, %113, %cst_52 {dimension_numbers = #tpu.dot_dimension_numbers<[1], [0], [0], [1], [0, 0, 1, 1], [], []>} : vector<8x32xf32>, vector<32x64xf32>, vector<8x64xf32> -> vector<8x64xf32>
    %c0_53 = arith.constant 0 : index
    %c0_54 = arith.constant 0 : index
    %115 = vector.load %arg11[%c0_53, %c0_54] : memref<1x64xf32, #tpu.memory_space<vmem>>, vector<1x64xf32>
    %116 = vector.broadcast %115 : vector<1x64xf32> to vector<8x64xf32>
    %117 = arith.addf %114, %116 : vector<8x64xf32>
    %118 = arith.mulf %117, %117 : vector<8x64xf32>
    %119 = arith.mulf %117, %118 : vector<8x64xf32>
    %cst_55 = arith.constant 4.471500e-02 : f32
    %120 = vector.broadcast %cst_55 : f32 to vector<8x64xf32>
    %121 = arith.mulf %120, %119 : vector<8x64xf32>
    %122 = arith.addf %117, %121 : vector<8x64xf32>
    %cst_56 = arith.constant 0.797884583 : f32
    %123 = vector.broadcast %cst_56 : f32 to vector<8x64xf32>
    %124 = arith.mulf %123, %122 : vector<8x64xf32>
    %125 = math.tanh %124 : vector<8x64xf32>
    %cst_57 = arith.constant 1.000000e+00 : f32
    %126 = vector.broadcast %cst_57 : f32 to vector<8x64xf32>
    %127 = arith.addf %126, %125 : vector<8x64xf32>
    %cst_58 = arith.constant 5.000000e-01 : f32
    %128 = vector.broadcast %cst_58 : f32 to vector<8x64xf32>
    %129 = arith.mulf %128, %127 : vector<8x64xf32>
    %130 = arith.mulf %117, %129 : vector<8x64xf32>
    %c0_59 = arith.constant 0 : index
    %c0_60 = arith.constant 0 : index
    %131 = vector.load %arg12[%c0_59, %c0_60] : memref<64x32xf32, #tpu.memory_space<vmem>>, vector<64x32xf32>
    %cst_61 = arith.constant dense<0.000000e+00> : vector<8x32xf32>
    %132 = tpu.matmul %130, %131, %cst_61 {dimension_numbers = #tpu.dot_dimension_numbers<[1], [0], [0], [1], [0, 0, 1, 1], [], []>} : vector<8x64xf32>, vector<64x32xf32>, vector<8x32xf32> -> vector<8x32xf32>
    %c0_62 = arith.constant 0 : index
    %c0_63 = arith.constant 0 : index
    %133 = vector.load %arg13[%c0_62, %c0_63] : memref<1x32xf32, #tpu.memory_space<vmem>>, vector<1x32xf32>
    %134 = vector.broadcast %133 : vector<1x32xf32> to vector<8x32xf32>
    %135 = arith.addf %132, %134 : vector<8x32xf32>
    %136 = arith.addf %112, %135 : vector<8x32xf32>
    %c0_64 = arith.constant 0 : index
    %c0_65 = arith.constant 0 : index
    %137 = vector.load %arg14[%c0_64, %c0_65] : memref<1x32xf32, #tpu.memory_space<vmem>>, vector<1x32xf32>
    %c0_66 = arith.constant 0 : index
    %c0_67 = arith.constant 0 : index
    %138 = vector.load %arg15[%c0_66, %c0_67] : memref<1x32xf32, #tpu.memory_space<vmem>>, vector<1x32xf32>
    %cst_68 = arith.constant dense<0.000000e+00> : vector<8xf32>
    %139 = vector.multi_reduction <add>, %136, %cst_68 [1] : vector<8x32xf32> to vector<8xf32>
    %140 = vector.shape_cast %139 : vector<8xf32> to vector<8x1xf32>
    %cst_69 = arith.constant 3.200000e+01 : f32
    %141 = vector.broadcast %cst_69 : f32 to vector<8x1xf32>
    %142 = arith.divf %140, %141 : vector<8x1xf32>
    %143 = vector.broadcast %142 : vector<8x1xf32> to vector<8x32xf32>
    %144 = arith.subf %136, %143 : vector<8x32xf32>
    %145 = arith.mulf %144, %144 : vector<8x32xf32>
    %cst_70 = arith.constant dense<0.000000e+00> : vector<8xf32>
    %146 = vector.multi_reduction <add>, %145, %cst_70 [1] : vector<8x32xf32> to vector<8xf32>
    %147 = vector.shape_cast %146 : vector<8xf32> to vector<8x1xf32>
    %cst_71 = arith.constant 3.200000e+01 : f32
    %148 = vector.broadcast %cst_71 : f32 to vector<8x1xf32>
    %149 = arith.divf %147, %148 : vector<8x1xf32>
    %cst_72 = arith.constant 9.99999974E-6 : f32
    %150 = vector.broadcast %cst_72 : f32 to vector<8x1xf32>
    %151 = arith.addf %149, %150 : vector<8x1xf32>
    %152 = math.rsqrt %151 : vector<8x1xf32>
    %153 = vector.broadcast %152 : vector<8x1xf32> to vector<8x32xf32>
    %154 = arith.mulf %144, %153 : vector<8x32xf32>
    %155 = vector.broadcast %137 : vector<1x32xf32> to vector<8x32xf32>
    %156 = arith.mulf %154, %155 : vector<8x32xf32>
    %157 = vector.broadcast %138 : vector<1x32xf32> to vector<8x32xf32>
    %158 = arith.addf %156, %157 : vector<8x32xf32>
    %c0_73 = arith.constant 0 : index
    %c0_74 = arith.constant 0 : index
    %c0_75 = arith.constant 0 : index
    %159 = vector.load %arg16[%c0_73, %c0_74, %c0_75] : memref<1x8x32xf32, #tpu.memory_space<vmem>>, vector<1x8x32xf32>
    %160 = vector.shape_cast %159 : vector<1x8x32xf32> to vector<8x32xf32>
    %161 = vector.shape_cast %158 : vector<8x32xf32> to vector<1x8x32xf32>
    tpu.vector_store %arg16[%c0_73, %c0_74, %c0_75], %161 {strides = array<i32>} : memref<1x8x32xf32, #tpu.memory_space<vmem>>, vector<1x8x32xf32>,
    return
  }
  func.func @transform_0(%arg0: i32, %arg1: i32) -> (i32, i32, i32) {
    %c0_i32 = arith.constant 0 : i32
    %c0_i32_0 = arith.constant 0 : i32
    return %arg0, %arg1, %c0_i32 : i32, i32, i32
  }
  func.func @transform_1(%arg0: i32, %arg1: i32) -> (i32, i32, i32) {
    %c0_i32 = arith.constant 0 : i32
    %c0_i32_0 = arith.constant 0 : i32
    %c0_i32_1 = arith.constant 0 : i32
    return %arg0, %c0_i32, %c0_i32_0 : i32, i32, i32
  }
  func.func @transform_2(%arg0: i32, %arg1: i32) -> (i32, i32) {
    %c0_i32 = arith.constant 0 : i32
    %c0_i32_0 = arith.constant 0 : i32
    %c0_i32_1 = arith.constant 0 : i32
    return %c0_i32, %c0_i32_0 : i32, i32
  }
  func.func @transform_3(%arg0: i32, %arg1: i32) -> (i32, i32) {
    %c0_i32 = arith.constant 0 : i32
    %c0_i32_0 = arith.constant 0 : i32
    %c0_i32_1 = arith.constant 0 : i32
    return %c0_i32, %c0_i32_0 : i32, i32
  }
  func.func @transform_4(%arg0: i32, %arg1: i32) -> (i32, i32) {
    %c0_i32 = arith.constant 0 : i32
    %c0_i32_0 = arith.constant 0 : i32
    %c0_i32_1 = arith.constant 0 : i32
    return %c0_i32, %c0_i32_0 : i32, i32
  }
  func.func @transform_5(%arg0: i32, %arg1: i32) -> (i32, i32) {
    %c0_i32 = arith.constant 0 : i32
    %c0_i32_0 = arith.constant 0 : i32
    %c0_i32_1 = arith.constant 0 : i32
    return %c0_i32, %c0_i32_0 : i32, i32
  }
  func.func @transform_6(%arg0: i32, %arg1: i32) -> (i32, i32) {
    %c0_i32 = arith.constant 0 : i32
    %c0_i32_0 = arith.constant 0 : i32
    %c0_i32_1 = arith.constant 0 : i32
    return %c0_i32, %c0_i32_0 : i32, i32
  }
  func.func @transform_7(%arg0: i32, %arg1: i32) -> (i32, i32) {
    %c0_i32 = arith.constant 0 : i32
    %c0_i32_0 = arith.constant 0 : i32
    %c0_i32_1 = arith.constant 0 : i32
    return %c0_i32, %c0_i32_0 : i32, i32
  }
  func.func @transform_8(%arg0: i32, %arg1: i32) -> (i32, i32) {
    %c0_i32 = arith.constant 0 : i32
    %c0_i32_0 = arith.constant 0 : i32
    %c0_i32_1 = arith.constant 0 : i32
    return %c0_i32, %c0_i32_0 : i32, i32
  }
  func.func @transform_9(%arg0: i32, %arg1: i32) -> (i32, i32) {
    %c0_i32 = arith.constant 0 : i32
    %c0_i32_0 = arith.constant 0 : i32
    %c0_i32_1 = arith.constant 0 : i32
    return %c0_i32, %c0_i32_0 : i32, i32
  }
  func.func @transform_10(%arg0: i32, %arg1: i32) -> (i32, i32) {
    %c0_i32 = arith.constant 0 : i32
    %c0_i32_0 = arith.constant 0 : i32
    %c0_i32_1 = arith.constant 0 : i32
    return %c0_i32, %c0_i32_0 : i32, i32
  }
  func.func @transform_11(%arg0: i32, %arg1: i32) -> (i32, i32) {
    %c0_i32 = arith.constant 0 : i32
    %c0_i32_0 = arith.constant 0 : i32
    %c0_i32_1 = arith.constant 0 : i32
    return %c0_i32, %c0_i32_0 : i32, i32
  }
  func.func @transform_12(%arg0: i32, %arg1: i32) -> (i32, i32) {
    %c0_i32 = arith.constant 0 : i32
    %c0_i32_0 = arith.constant 0 : i32
    %c0_i32_1 = arith.constant 0 : i32
    return %c0_i32, %c0_i32_0 : i32, i32
  }
  func.func @transform_13(%arg0: i32, %arg1: i32) -> (i32, i32) {
    %c0_i32 = arith.constant 0 : i32
    %c0_i32_0 = arith.constant 0 : i32
    %c0_i32_1 = arith.constant 0 : i32
    return %c0_i32, %c0_i32_0 : i32, i32
  }
  func.func @transform_14(%arg0: i32, %arg1: i32) -> (i32, i32, i32) {
    %c0_i32 = arith.constant 0 : i32
    %c0_i32_0 = arith.constant 0 : i32
    return %arg0, %arg1, %c0_i32 : i32, i32, i32
  }
}

</mosaic_0001>

<bundles_post_ra>
// kernel: tpu_custom_call.1
= control target key start
LH: loop header
LB: loop body
LE: loop exit
PB: predicated region body
PF: predicated region fallthrough
CT: control target
= control target key end

     0   :  { %s1906_s0 = inlined_call_operand.hbm [shape: f32[2,8,32], index: 0, kind: input, shape index: {}]   ;;  %s1907_s1 = inlined_call_operand.hbm [shape: f32[2,8,32], index: 1, kind: input, shape index: {}]   ;;  %s1908_s2 = inlined_call_operand.vmem [shape: f32[32,96], index: 2, kind: input, shape index: {}]   ;;  %s1909_s3 = inlined_call_operand.vmem [shape: f32[1,96], index: 3, kind: input, shape index: {}]   ;;  %s1910_s4 = inlined_call_operand.vmem [shape: f32[32,32], index: 4, kind: input, shape index: {}]   ;;  %s1911_s5 = inlined_call_operand.vmem [shape: f32[1,32], index: 5, kind: input, shape index: {}]   ;;  %s1912_s6 = inlined_call_operand.vmem [shape: f32[1,32], index: 6, kind: input, shape index: {}]   ;;  %s1913_s7 = inlined_call_operand.vmem [shape: f32[1,32], index: 7, kind: input, shape index: {}]   ;;  %s1914_s8 = inlined_call_operand.vmem [shape: f32[32,64], index: 8, kind: input, shape index: {}]   ;;  %s1915_s9 = inlined_call_operand.vmem [shape: f32[1,64], index: 9, kind: input, shape index: {}]   ;;  %s1916_s10 = inlined_call_operand.vmem [shape: f32[64,32], index: 10, kind: input, shape index: {}]   ;;  %s1917_s11 = inlined_call_operand.vmem [shape: f32[1,32], index: 11, kind: input, shape index: {}]   ;;  %s1918_s12 = inlined_call_operand.vmem [shape: f32[1,32], index: 12, kind: input, shape index: {}]   ;;  %s1919_s13 = inlined_call_operand.vmem [shape: f32[1,32], index: 13, kind: input, shape index: {}]   ;;  %s1920_s14 = inlined_call_operand.hbm [shape: f32[2,8,32], index: 14, kind: output, shape index: {}]  }
   0x1   :  { %1929 = sst [smem:[#allocation19_spill]] %s1918_s12 }
   0x2   :  { %1930 = sst [smem:[#allocation20_spill]] %s1919_s13 }
   0x3   :  { %1931 = sst [smem:[#allocation21_spill]] %s1920_s14 }
   0x4   :  { %19 = vsyncpa [#allocation3], 0 }
   0x5   :  { %21 = vsyncpa [#allocation3 + $0x1], 0 }
   0x6   :  { %22 = vsyncpa [#allocation6], 0 }
   0x7   :  { %24 = vsyncpa [#allocation6 + $0x1], 0 }
   0x8   :  { %25 = vsyncpa [#allocation4], 0 }
   0x9   :  { %27 = vsyncpa [#allocation4 + $0x1], 0  ;;  %s1633_s29 = smov 0   ;;  %s1635_s30 = smov 0  }
   0xa   :  { %s1637_s15 = smov 0   ;;  %s1639_s16 = smov 0  }
   0xb   :  { %s1641_s17 = smov 0   ;;  %s1643_s18 = smov 0  }
   0xc LB: > { %1932 = sst [smem:[#allocation11_spill]] %s1528_s29  ;;  %s1249_s19 = sadd.s32 4294967295, %s1548_s18   ;;  %s1548_s18 = sphi %s1643_s18, %s33_s18   ;;  %s1544_s17 = sphi %s1641_s17, %s1954_s17   ;;  %s1540_s16 = sphi %s1639_s16, %s1953_s16   ;;  %s1536_s15 = sphi %s1637_s15, %s1952_s15   ;;  %s1532_s30 = sphi %s1635_s30, %s1956_s30   ;;  %s1528_s29 = sphi %s1633_s29, %s1955_s29  }
   0xd   : > { %1933 = sst [smem:[#allocation12_spill]] %s1536_s15  ;;  %s1250_s20 = sadd.s32 4294967294, %s1548_s18  }
   0xe   : > { %1934 = sst [smem:[#allocation13_spill]] %s1540_s16  ;;  %s45_s21 = sadd.s32 1, %s1544_s17 }
   0xf   : > { %1935 = sst [smem:[#allocation14_spill]] %s1544_s17  ;;  %s54_s22 = sadd.s32 1, %s1536_s15 }
  0x10   : > { %p47_p0 = scmp.ge.s32.totalorder %s45_s21, 2  ;;  %p61_p1 = scmp.ne.s32.totalorder %s1536_s15, %s1532_s30 }
  0x11   : > { %p62_p2 = scmp.eq.s32.totalorder %s1548_s18, 0  ;;  %p67_p3 = scmp.ne.s32.totalorder %s1532_s30, %s1528_s29 }
  0x12   : > { %s1958_s21 = smov (%p47_p0, %s45_s21), 0  ;;  %p68_p5 = scmp.eq.s32.totalorder %s1249_s19, 0 }
  0x13   : > { %1936 = sst [smem:[#allocation15_spill]] %s1958_s21  ;;  %p1674_p4 = por %p62_p2, %p61_p1 }
  0x14   : > { %s49_s24 = ssub.s32 %s1544_s17, %s1958_s21  ;;  %p371_p6 = scmp.eq.s32.totalorder %s1249_s19, 1 }
  0x15   : > { %p52_p7 = scmp.eq.s32.totalorder %s49_s24, 0  ;;  %p1680_p8 = por %p68_p5, %p67_p3 }
  0x16   : > { %p1684_p9 = por %p371_p6, %p61_p1  ;;  %p377_p10 = scmp.eq.s32.totalorder %s1250_s20, 1 }
  0x17   : > { %s1689_s27 = scalar_select %p52_p7, %s1536_s15, %s54_s22  }
  0x18   : > { %s1939_s26 = scalar_select %p1684_p9, 1, 0 }
  0x19   : > { %1941 = sst [smem:[#allocation17_spill]] %s1689_s27  ;;  %p1691_p11 = por %p377_p10, %p67_p3 }
  0x1a   : > { %1940 = sst [smem:[#allocation16_spill]] %s1939_s26  ;;  %p1252_p12 = scmp.ge.s32.totalorder %s1548_s18, 2 }
  0x1b   : > { %s1942_s28 = scalar_select %p1691_p11, 1, 0 }
  0x1c   : > { %p1302_p13 = scmp.lt.s32.totalorder %s1548_s18, 2  ;;  %s433_s19 = sand.u32 1, %s1536_s15  }
  0x1d   : > { %1943 = sst [smem:[#allocation18_spill]] %s1942_s28  ;;  %s1253_s24 = sshll.u32 %s433_s19, 3 }
  0x1e   : > { %s1254_s21 = sshll.u32 %s1544_s17, 3  ;;  %s437_s12 = scalar_lea.vmem [#allocation2], %s1253_s24 }
  0x1f   : > { %s442_s14 = scalar_lea.hbm %s1906_s0, %s1254_s21  ;;  %s446_s26 = sshll.u32 %s437_s12, 4  ;;  %s447_s26 = int_to_ptr.vmem [resolvable:$true] %s446_s26 }
  0x20   : > { %s444_s16 = sshll.u32 %s442_s14, 4  ;;  %p1292_p0 = pnand %p1302_p13, %p1674_p4  ;;  %s445_s16 = int_to_ptr.hbm [resolvable:$true] %s444_s16 }
  0x21   : > { %p1257_p1 = scmp.ge.s32.totalorder %s1548_s18, 1  ;;  %p470_p2 = scmp.lt.s32.totalorder %s1548_s18, 3 }
  0x22   : > { %s434_s20 = scalar_lea.sflag [#allocation3], %s433_s19  ;;  %s461_s17 = scalar_lea.hbm %s1907_s1, %s1254_s21 }
  0x23   : > { %1294 = dma.hbm_to_vmem [thread:$0]  (!%p1292_p0), %s445_s16, 128, %s447_s26, %s434_s20  }
  0x24   : > { %p471_p3 = pnand %p1257_p1, %p470_p2  ;;  %s457_s15 = scalar_lea.vmem [#allocation5], %s1253_s24 }
  0x25   : > { %s465_s28 = sshll.u32 %s457_s15, 4  ;;  %s463_s13 = sshll.u32 %s461_s17, 4  ;;  %s466_s28 = int_to_ptr.vmem [resolvable:$true] %s465_s28  ;;  %s464_s13 = int_to_ptr.hbm [resolvable:$true] %s463_s13 }
  0x26   : > { %s454_s12 = scalar_lea.sflag [#allocation6], %s433_s19  ;;  %474 = sbr.rel (%p471_p3) target bundleno = 2334 (0x91e), region = 76 }
  0x27   : > { %1297 = dma.hbm_to_vmem [thread:$0]  (!%p1292_p0), %s464_s13, 128, %s466_s28, %s454_s12  }
  0x28   : > { %s1710_s14 = sand.u32 (!%p471_p3), 1, %s1532_s30  }
  0x29   : > { %s1713_s29 = sshll.u32 (!%p471_p3), %s1710_s14, 3  ;;  %s477_s16 = scalar_lea.sflag (!%p471_p3), [#allocation3], %s1710_s14 }
  0x2a   : > { %s480_s23 = scalar_lea.vmem (!%p471_p3), [#allocation2], %s1713_s29 }
  0x2b   : > { %1515 = dma.done.wait (%p1680_p8), %s477_s16, 128  }
  0x2c   : > { %1517 = vsyncadd (%p1680_p8), %s477_s16, 4294967168  ;;  %s487_s15 = scalar_lea.sflag [#allocation6], %s1710_s14  ;;  %s490_s17 = scalar_lea.vmem [#allocation5], %s1713_s29 }
  0x2d   : > { %1519 = dma.done.wait (%p1680_p8), %s487_s15, 128  }
  0x2e   : > { %1521 = vsyncadd (%p1680_p8), %s487_s15, 4294967168  ;;  %v545_v0 = vld [vmem:[%s1908_s2 + $0x10] sm:$0xff]  ;;  %v546_v1 = vld [vmem:[%s1908_s2 + $0x18] sm:$0xff]  ;;  %s1550_s19 = smov 96   ;;  %vm551_vm0 = vcmask 261120   ;;  %vm617_vm1 = vcmask 64512  }
  0x2f   : > { %v1360_v2 = vpack.i.bf16 %v545_v0, %v546_v1  ;;  %567 = vmatpush.msra.mxu0 %v546_v1  ;;  %v543_v3 = vld [vmem:[%s1908_s2] sm:$0xff]  ;;  %v544_v4 = vld [vmem:[%s1908_s2 + $0x8] sm:$0xff]  ;;  %v542_v14 = vld [vmem:[%s490_s17] sm:$0xff]  ;;  %s1551_s16 = smov 120   ;;  %s1553_s15 = smov 104   ;;  %vm1071_vm6 = vcmask 523264  }
  0x30   : > { %v1365_v5 = vpack.i.bf16 %v543_v3, %v544_v4  ;;  %v1741_v6 = vld [vmem:[%s480_s23] sm:$0xff]  ;;  %s1552_s23 = smov 112   ;;  %s1554_s26 = smov 80  }
  0x31   : > { %1361 = vrot.lane.b32.xlu0 %v1360_v2, %s1550_s19  ;;  %568 = vmatpush.msra.mxu0 %v545_v0  ;;  %v1370_v7 = vld [vmem:[%s1909_s3] ss:$0 sm:$0xff]  ;;  %s1555_s27 = smov 72   ;;  %s1556_s28 = smov 88  }
  0x32   : > { %591 = vrot.lane.b32.xlu1 %v1370_v7, %s1550_s19  ;;  %v681_v33 = vld [vmem:[%s1910_s4] sm:$0xff]  ;;  %s1944_s17 = sld [smem:[#allocation13_spill]] }
  0x33   : > { %569 = vmatpush.msra.mxu0 %v544_v4  ;;  %s1946_s20 = sld [smem:[#allocation21_spill]] }
  0x35   : > { %570 = vmatpush.msra.mxu0 %v543_v3 }
  0x36   : > { %1261 = vmatmul.msk.f32.vlgmr.msra.gmra.mxu0 %vm551_vm0, %v1741_v6 }
  0x38   : > { %s1282_s21 = sshll.u32 %s1944_s17, 3 }
  0x39   : > { %1366 = vrot.lane.b32.xlu0 %v1365_v5, %s1550_s19  ;;  %s1141_s25 = scalar_lea.hbm %s1946_s20, %s1282_s21 }
  0x3a   : > { %s1145_s17 = sshll.u32 %s1141_s25, 4  ;;  %s1146_s17 = int_to_ptr.hbm [resolvable:$true] %s1145_s17 }
  0xa3   : > { %v1362_v8 = vpop.permute.xlu0 %1361 }
  0xa4   : > { %v1363_v9 = vunpack.i.l.bf16 %v1362_v8  ;;  %v1364_v10 = vunpack.i.h.bf16 %v1362_v8  ;;  %v592_v15 = vpop.permute.xlu1 %591 }
  0xa6   : > { %609 = vmatpush.msra.mxu1 %v1363_v9 }
  0xa8   : > { %610 = vmatpush.msra.mxu1 %v1364_v10 }
  0xab   : > { %v1367_v11 = vpop.permute.xlu0 %1366 }
  0xac   : > { %v1368_v12 = vunpack.i.l.bf16 %v1367_v11  ;;  %v1369_v13 = vunpack.i.h.bf16 %v1367_v11 }
  0xae   : > { %611 = vmatpush.msra.mxu1 %v1368_v12  ;;  %v747_v12 = vld [vmem:[%s1910_s4 + $0x8] sm:$0xff] }
  0xaf   : > { %766 = vmatpush.msrb.mxu0 %v747_v12 }
  0xb0   : > { %612 = vmatpush.msra.mxu1 %v1369_v13  ;;  %v859_v13 = vld [vmem:[%s1910_s4 + $0x10] sm:$0xff] }
  0xb1   : > { %1262 = vmatmul.msk.f32.vlgmr.msra.gmra.mxu1 %vm551_vm0, %v542_v14  ;;  %878 = vmatpush.msra.mxu0 %v859_v13  ;;  %v1375_v13 = vld [vmem:[%s1917_s11] ss:$0 sm:$0xff] }
  0xb3   : > { %v572_v16 = vpop.f32.mrf.mxu0 }
  0xb4   : > { %v573_v19 = vadd.f32 %v1370_v7, %v572_v16  ;;  %v949_v7 = vld [vmem:[%s1910_s4 + $0x18] sm:$0xff] }
 0x12e   : > { %v614_v17 = vpop.f32.mrf.mxu1 }
 0x12f   : > { %v1750_v18 = vadd.f32 %v614_v17, %v592_v15 }
 0x131   : > { %684 = vrot.lane.b32.xlu0 %v1750_v18, %s1551_s16  ;;  %1263 = vmatpush.xpose.msk.msra.mxu2 %vm617_vm1, %v1750_v18 }
 0x134   : > { %1264 = vmatmul.msk.f32.vlgmr.msra.gmra.mxu2 %vm617_vm1, %v573_v19 }
 0x139   : > { %682 = vrot.lane.b32.xlu0 %v573_v19, %s1551_s16  ;;  %s1948_s16 = sld [smem:[#allocation20_spill]] }
 0x141   : > { %796 = vrot.lane.b32.xlu0 %v1750_v18, %s1552_s23 }
 0x149   : > { %794 = vrot.lane.b32.xlu0 %v573_v19, %s1552_s23  ;;  %s540_s23 = scalar_lea.vmem [#allocation7], %s1713_s29  ;;  %s1482_s29 = scalar_lea.hbm %s1946_s20, 16 }
 0x1a3   : > { %v685_v27 = vpop.permute.xlu0 %684 }
 0x1ab   : > { %v683_v30 = vpop.permute.xlu0 %682 }
 0x1b3   : > { %v797_v35 = vpop.permute.xlu0 %796 }
 0x1b7   : > { %v641_v20 = vpop.f32.mrf.mxu2 }
 0x1b8   : > { %v644_v21 = vsel %vm617_vm1, %v641_v20, -inf }
 0x1b9   : > { %645 = vmax.xlane.f32.xlu1 %v644_v21 }
 0x1bb   : > { %v795_v38 = vpop.permute.xlu0 %794 }
 0x22c   : > { %v646_v22 = vpop.xlane.xlu1 %645 }
 0x22d   : > { %v647_v23 = vsub.f32 %v641_v20, %v646_v22  ;;  %v1371_v20 = vld [vmem:[%s1911_s5] ss:$0 sm:$0xff] }
 0x22f   : > { %v648_v24 = vmul.f32 1.442695, %v647_v23 }
 0x231   : > { %1378 = vpow2.f32 %v648_v24 }
 0x237   : > { %v1379_v25 = vpop.eup %1378 }
 0x238   : > { %v650_v26 = vsel %vm617_vm1, %v1379_v25, 0.0 }
 0x239   : > { %651 = vadd.xlane.f32.xlu2 %v650_v26  ;;  %v1557_v26 = vmov 32.0  }
 0x251   : > { %655 = vrot.lane.b32.xlu2 %v1750_v18, %s1550_s19 }
 0x259   : > { %886 = vrot.lane.b32.xlu2 %v1750_v18, %s1553_s15 }
 0x261   : > { %884 = vrot.lane.b32.xlu2 %v573_v19, %s1553_s15  ;;  %s1143_s15 = sshll.u32 %s540_s23, 4  ;;  %s1144_s15 = int_to_ptr.vmem [resolvable:$true] %s1143_s15 }
 0x2ac   : > { %v652_v28 = vpop.xlane.xlu2 %651 }
 0x2ad   : > { %1380 = vrcp.f32 %v652_v28 }
 0x2b3   : > { %v1381_v29 = vpop.eup %1380 }
 0x2b4   : > { %v656_v31 = vpop.permute.xlu2 %655  ;;  %v654_v32 = vmul.f32 %v1381_v29, %v1379_v25 }
 0x2b5   : > { %676 = vmatpush.msra.mxu3 %v656_v31 }
 0x2b6   : > { %1265 = vmatmul.msk.f32.vlgmr.msra.gmra.mxu3 %vm617_vm1, %v654_v32 }
 0x2b7   : > { %1266 = vmatpush.xpose.msk.msrb.mxu3 %vm617_vm1, %v685_v27 }
 0x2bb   : > { %789 = vmatpush.msra.mxu3 %v681_v33 }
 0x2bc   : > { %v887_v34 = vpop.permute.xlu2 %886 }
 0x2bd   : > { %1275 = vmatpush.xpose.msk.msrb.mxu1 %vm617_vm1, %v887_v34 }
 0x2be   : > { %1267 = vmatmul.msk.f32.vlgmr.msrb.gmra.mxu3 %vm617_vm1, %v683_v30 }
 0x2bf   : > { %1271 = vmatpush.xpose.msk.msrb.mxu3 %vm617_vm1, %v797_v35 }
 0x2c4   : > { %v885_v36 = vpop.permute.xlu2 %884 }
 0x2c5   : > { %1276 = vmatmul.msk.f32.vlgmr.msrb.gmra.mxu1 %vm617_vm1, %v885_v36 }
 0x339   : > { %v678_v37 = vpop.f32.mrf.mxu3 }
 0x33a   : > { %1270 = vmatmul.msk.f32.vlgmr.msra.gmra.mxu3 %vm617_vm1, %v678_v37  ;;  %v1022_v37 = vld [vmem:[%s1914_s8 + $0x18] sm:$0xff] }
 0x341   : > { %v707_v39 = vpop.f32.mrf.mxu3 }
 0x342   : > { %1272 = vmatmul.msk.f32.vlgmr.msrb.gmra.mxu3 %vm617_vm1, %v795_v38  ;;  %v909_v40 = vpop.f32.mrf.mxu1  ;;  %v710_v41 = vsel %vm617_vm1, %v707_v39, -inf  ;;  %v1021_v38 = vld [vmem:[%s1914_s8 + $0x10] sm:$0xff] }
 0x343   : > { %711 = vmax.xlane.f32.xlu0 %v710_v41  ;;  %v912_v42 = vsel %vm617_vm1, %v909_v40, -inf }
 0x344   : > { %913 = vmax.xlane.f32.xlu2 %v912_v42 }
 0x357   : > { %833 = vrot.lane.b32.xlu0 %v1750_v18, %s1554_s26  ;;  %s1130_s26 = scalar_lea.sflag [#allocation4], %s1710_s14 }
 0x35c   : > { %923 = vrot.lane.b32.xlu2 %v1750_v18, %s1555_s27  ;;  %s1476_s27 = sshra.s32 %s1146_s17, 4  ;;  %s1477_s27 = int_to_ptr.hbm [resolvable:$true] %s1476_s27 }
 0x35d   : > { %s1478_s21 = scalar_lea.hbm %s1477_s27, 8  ;;  %p1483_p7 = scmp.lt.s32.totalorder %s1477_s27, %s1946_s20 }
 0x35e   : > { %p1479_p4 = scmp.ne.s32.totalorder %s1477_s27, %s1478_s21  ;;  %p1484_p8 = scmp.lt.s32.totalorder %s1482_s29, %s1478_s21 }
 0x360   : > { %p1480_p5 = pnand %p1479_p4, %p1684_p9  ;;  %p1485_p10 = por %p1484_p8, %p1483_p7 }
 0x362   : > { %p1481_p6 = pneg %p1480_p5 }
 0x364   : > { %p1486_p13 = pnand %p1485_p10, %p1481_p6 }
 0x3b6   : > { %v712_v43 = vpop.xlane.xlu0 %711 }
 0x3b7   : > { %v713_v44 = vsub.f32 %v707_v39, %v712_v43  ;;  %v914_v45 = vpop.xlane.xlu2 %913  ;;  %v1020_v39 = vld [vmem:[%s1914_s8 + $0x8] sm:$0xff] }
 0x3b8   : > { %v915_v50 = vsub.f32 %v909_v40, %v914_v45  ;;  %v1019_v40 = vld [vmem:[%s1914_s8] sm:$0xff] }
 0x3b9   : > { %v714_v46 = vmul.f32 1.442695, %v713_v44 }
 0x3ba   : > { %v916_v52 = vmul.f32 1.442695, %v915_v50  ;;  %v1372_v50 = vld [vmem:[%s1912_s6] ss:$0 sm:$0xff] }
 0x3bb   : > { %1382 = vpow2.f32 %v714_v46 }
 0x3bc   : > { %1384 = vpow2.f32 %v916_v52 }
 0x3bd   : > { %v791_v47 = vpop.f32.mrf.mxu3 }
 0x3bf   : > { %v924_v48 = vpop.permute.xlu2 %923 }
 0x3c0   : > { %944 = vmatpush.msra.mxu3 %v924_v48 }
 0x3c1   : > { %v1383_v49 = vpop.eup %1382 }
 0x3c2   : > { %v716_v51 = vsel %vm617_vm1, %v1383_v49, 0.0  ;;  %v1385_v55 = vpop.eup %1384 }
 0x3c3   : > { %717 = vadd.xlane.f32.xlu1 %v716_v51  ;;  %v918_v56 = vsel %vm617_vm1, %v1385_v55, 0.0 }
 0x3c5   : > { %v819_v53 = vpop.f32.mrf.mxu3 }
 0x3c6   : > { %v822_v54 = vsel %vm617_vm1, %v819_v53, -inf }
 0x3c9   : > { %v834_v8 = vpop.permute.xlu0 %833 }
 0x3cb   : > { %823 = vmax.xlane.f32.xlu1 %v822_v54 }
 0x3d3   : > { %919 = vadd.xlane.f32.xlu1 %v918_v56  ;;  %v1066_v56 = vld [vmem:[%s1916_s10 + $0x38] sm:$0xff] }
 0x3d4   : > { %1083 = vmatpush.msra.mxu1 %v1066_v56 }
 0x436   : > { %v718_v57 = vpop.xlane.xlu1 %717 }
 0x43e   : > { %v824_v58 = vpop.xlane.xlu1 %823 }
 0x43f   : > { %v825_v59 = vsub.f32 %v819_v53, %v824_v58  ;;  %v1373_v53 = vld [vmem:[%s1913_s7] ss:$0 sm:$0xff]  ;;  %v1064_v58 = vld [vmem:[%s1916_s10 + $0x28] sm:$0xff] }
 0x441   : > { %v826_v60 = vmul.f32 1.442695, %v825_v59  ;;  %v1063_v59 = vld [vmem:[%s1916_s10 + $0x20] sm:$0xff] }
 0x443   : > { %1386 = vpow2.f32 %v826_v60  ;;  %v1062_v60 = vld [vmem:[%s1916_s10 + $0x18] sm:$0xff] }
 0x446   : > { %v920_v61 = vpop.xlane.xlu1 %919 }
 0x447   : > { %1388 = vrcp.f32 %v920_v61  ;;  %v1061_v61 = vld [vmem:[%s1916_s10 + $0x10] sm:$0xff] }
 0x448   : > { %1390 = vrcp.f32 %v718_v57  ;;  %v1065_v57 = vld [vmem:[%s1916_s10 + $0x30] sm:$0xff] }
 0x449   : > { %v1387_v62 = vpop.eup %1386  ;;  %1084 = vmatpush.msra.mxu1 %v1065_v57 }
 0x44a   : > { %v828_v63 = vsel %vm617_vm1, %v1387_v62, 0.0 }
 0x44b   : > { %829 = vadd.xlane.f32.xlu1 %v828_v63  ;;  %1085 = vmatpush.msra.mxu1 %v1064_v58  ;;  %v1059_v63 = vld [vmem:[%s1916_s10] sm:$0xff] }
 0x44d   : > { %v1389_v0 = vpop.eup %1388  ;;  %1086 = vmatpush.msra.mxu1 %v1063_v59 }
 0x44e   : > { %v922_v1 = vmul.f32 %v1389_v0, %v1385_v55  ;;  %v1391_v3 = vpop.eup %1390  ;;  %v1374_v0 = vld [vmem:[%s1915_s9] ss:$0 sm:$0xff] }
 0x44f   : > { %v720_v5 = vmul.f32 %v1391_v3, %v1383_v49  ;;  %1087 = vmatpush.msra.mxu1 %v1062_v60 }
 0x450   : > { %1277 = vmatmul.msk.f32.vlgmr.msra.gmra.mxu3 %vm617_vm1, %v922_v1 }
 0x451   : > { %1088 = vmatpush.msra.mxu1 %v1061_v61 }
 0x464   : > { %721 = vrot.lane.b32.xlu1 %v1750_v18, %s1556_s28  ;;  %s1945_s28 = sld [smem:[#allocation19_spill]] }
 0x4be   : > { %v830_v2 = vpop.xlane.xlu1 %829 }
 0x4bf   : > { %1392 = vrcp.f32 %v830_v2 }
 0x4c0   : > { %1394 = vrcp.f32 %v1557_v26 }
 0x4c5   : > { %v1393_v9 = vpop.eup %1392 }
 0x4c6   : > { %v832_v10 = vmul.f32 %v1393_v9, %v1387_v62  ;;  %v1395_v27 = vpop.eup %1394  ;;  %v1060_v62 = vld [vmem:[%s1916_s10 + $0x8] sm:$0xff] }
 0x4c7   : > { %v986_v28 = vmul.f32 32.0, %v1395_v27  ;;  %vm990_vm2 = vweird.f32 %v1395_v27  ;;  %1089 = vmatpush.msra.mxu1 %v1060_v62 }
 0x4c9   : > { %v987_v29 = vsub.f32 1.0, %v986_v28  ;;  %1090 = vmatpush.msra.mxu1 %v1059_v63 }
 0x4cb   : > { %v988_v30 = vmul.f32 %v1395_v27, %v987_v29 }
 0x4cd   : > { %v989_v31 = vadd.f32 %v1395_v27, %v988_v30 }
 0x4cf   : > { %v1802_v32 = vsel %vm990_vm2, %v1395_v27, %v989_v31 }
 0x4d3   : > { %v946_v11 = vpop.f32.mrf.mxu3 }
 0x4d6   : > { %v722_v4 = vpop.permute.xlu1 %721 }
 0x4d7   : > { %742 = vmatpush.msrb.mxu2 %v722_v4 }
 0x4d8   : > { %1268 = vmatmul.msk.f32.vlgmr.msrb.gmra.mxu2 %vm617_vm1, %v720_v5 }
 0x4d9   : > { %854 = vmatpush.msra.mxu2 %v834_v8 }
 0x4db   : > { %968 = vmatpush.msrb.mxu2 %v949_v7 }
 0x4e0   : > { %1273 = vmatmul.msk.f32.vlgmr.msra.gmra.mxu2 %vm617_vm1, %v832_v10 }
 0x4e8   : > { %1278 = vmatmul.msk.f32.vlgmr.msrb.gmra.mxu2 %vm617_vm1, %v946_v11 }
 0x55b   : > { %v744_v14 = vpop.f32.mrf.mxu2 }
 0x55c   : > { %1269 = vmatmul.msk.f32.vlgmr.msrb.gmra.mxu0 %vm617_vm1, %v744_v14 }
 0x55d   : > { %1042 = vmatpush.msrb.mxu0 %v1022_v37 }
 0x55f   : > { %1043 = vmatpush.msrb.mxu0 %v1021_v38 }
 0x561   : > { %1044 = vmatpush.msrb.mxu0 %v1020_v39 }
 0x563   : > { %v856_v15 = vpop.f32.mrf.mxu2  ;;  %1045 = vmatpush.msrb.mxu0 %v1019_v40 }
 0x564   : > { %1274 = vmatmul.msk.f32.vlgmr.msra.gmra.mxu0 %vm617_vm1, %v856_v15 }
 0x56b   : > { %v970_v21 = vpop.f32.mrf.mxu2 }
 0x5d9   : > { %v768_v16 = vpop.f32.mrf.mxu0 }
 0x5da   : > { %v792_v17 = vadd.f32 %v791_v47, %v768_v16 }
 0x5e1   : > { %v880_v18 = vpop.f32.mrf.mxu0 }
 0x5e2   : > { %v883_v19 = vadd.f32 %v880_v18, %v792_v17 }
 0x5e4   : > { %v973_v22 = vadd.f32 %v970_v21, %v883_v19 }
 0x5e6   : > { %v978_v23 = vadd.f32 %v1371_v20, %v973_v22 }
 0x5e8   : > { %v979_v24 = vadd.f32 %v978_v23, %v1741_v6 }
 0x5ea   : > { %v982_v25 = vsel %vm551_vm0, %v979_v24, 0.0 }
 0x5eb   : > { %983 = vadd.xlane.f32.xlu1 %v982_v25 }
 0x65e   : > { %v984_v33 = vpop.xlane.xlu1 %983 }
 0x65f   : > { %v992_v34 = vmul.f32 %v1802_v32, %v984_v33  ;;  %v1376_v33 = vld [vmem:[%s1945_s28] ss:$0 sm:$0xff] }
 0x661   : > { %v993_v35 = vsub.f32 %v979_v24, %v992_v34 }
 0x663   : > { %v994_v36 = vmul.f32 %v993_v35, %v993_v35 }
 0x665   : > { %v995_v6 = vsel %vm551_vm0, %v994_v36, 0.0 }
 0x666   : > { %996 = vadd.xlane.f32.xlu0 %v995_v6 }
 0x6d9   : > { %v997_v41 = vpop.xlane.xlu0 %996 }
 0x6da   : > { %v998_v42 = vmul.f32 %v997_v41, %v1802_v32 }
 0x6dc   : > { %v999_v43 = vadd.f32 1e-05, %v998_v42 }
 0x6de   : > { %1396 = vrsqrt.f32 %v999_v43  ;;  %vm1006_vm4 = vweird.f32 %v999_v43 }
 0x6e4   : > { %v1397_v44 = vpop.eup %1396 }
 0x6e5   : > { %v1001_v45 = vmul.f32 %v1397_v44, %v999_v43  ;;  %vm1007_vm3 = vweird.f32 %v1397_v44 }
 0x6e6   : > { %vm1008_vm5 = vmor %vm1006_vm4, %vm1007_vm3 }
 0x6e7   : > { %v1002_v46 = vmul.f32 %v1397_v44, %v1001_v45 }
 0x6e9   : > { %v1003_v47 = vmul.f32 0.5, %v1002_v46 }
 0x6eb   : > { %v1004_v48 = vsub.f32 1.5, %v1003_v47 }
 0x6ed   : > { %v1005_v49 = vmul.f32 %v1397_v44, %v1004_v48 }
 0x6ef   : > { %v1009_v51 = vsel %vm1008_vm5, %v1397_v44, %v1005_v49 }
 0x6f0   : > { %v1010_v52 = vmul.f32 %v1009_v51, %v993_v35  ;;  %v1377_v35 = vld [vmem:[%s1948_s16] ss:$0 sm:$0xff] }
 0x6f2   : > { %v1014_v54 = vmul.f32 %v1372_v50, %v1010_v52 }
 0x6f4   : > { %v1018_v55 = vadd.f32 %v1373_v53, %v1014_v54 }
 0x6f6   : > { %1279 = vmatmul.msk.f32.vlgmr.msrb.gmra.mxu0 %vm551_vm0, %v1018_v55 }
 0x773   : > { %v1047_v1 = vpop.f32.mrf.mxu0 }
 0x774   : > { %v1048_v2 = vadd.f32 %v1374_v0, %v1047_v1 }
 0x776   : > { %v1050_v3 = vmul.f32 %v1048_v2, %v1048_v2 }
 0x778   : > { %v1051_v4 = vmul.f32 %v1050_v3, %v1048_v2 }
 0x77a   : > { %v1052_v5 = vmul.f32 0.044715, %v1051_v4 }
 0x77c   : > { %v1053_v7 = vadd.f32 %v1052_v5, %v1048_v2 }
 0x77e   : > { %v1054_v8 = vmul.f32 0.7978846, %v1053_v7 }
 0x780   : > { %1398 = vtanh.f32 %v1054_v8 }
 0x786   : > { %v1399_v9 = vpop.eup %1398 }
 0x787   : > { %v1056_v10 = vadd.f32 1.0, %v1399_v9 }
 0x789   : > { %v1057_v11 = vmul.f32 0.5, %v1056_v10 }
 0x78b   : > { %v1058_v12 = vmul.f32 %v1057_v11, %v1048_v2 }
 0x78d   : > { %1280 = vmatmul.msk.f32.vlgmr.msra.gmra.mxu1 %vm1071_vm6, %v1058_v12 }
 0x80a   : > { %v1092_v14 = vpop.f32.mrf.mxu1 }
 0x80b   : > { %v1093_v15 = vadd.f32 %v1375_v13, %v1092_v14 }
 0x80d   : > { %v1095_v16 = vadd.f32 %v1093_v15, %v1018_v55 }
 0x80f   : > { %v1098_v17 = vsel %vm551_vm0, %v1095_v16, 0.0 }
 0x810   : > { %1099 = vadd.xlane.f32.xlu2 %v1098_v17 }
 0x883   : > { %v1100_v18 = vpop.xlane.xlu2 %1099 }
 0x884   : > { %v1101_v19 = vmul.f32 %v1100_v18, %v1802_v32 }
 0x886   : > { %v1102_v20 = vsub.f32 %v1095_v16, %v1101_v19 }
 0x888   : > { %v1103_v21 = vmul.f32 %v1102_v20, %v1102_v20 }
 0x88a   : > { %v1104_v22 = vsel %vm551_vm0, %v1103_v21, 0.0 }
 0x88b   : > { %1105 = vadd.xlane.f32.xlu1 %v1104_v22 }
 0x8fe   : > { %v1106_v23 = vpop.xlane.xlu1 %1105 }
 0x8ff   : > { %v1107_v24 = vmul.f32 %v1106_v23, %v1802_v32 }
 0x901   : > { %v1108_v25 = vadd.f32 1e-05, %v1107_v24 }
 0x903   : > { %1400 = vrsqrt.f32 %v1108_v25  ;;  %vm1115_vm8 = vweird.f32 %v1108_v25 }
 0x909   : > { %v1401_v26 = vpop.eup %1400 }
 0x90a   : > { %v1110_v27 = vmul.f32 %v1401_v26, %v1108_v25  ;;  %vm1116_vm7 = vweird.f32 %v1401_v26 }
 0x90b   : > { %vm1117_vm9 = vmor %vm1115_vm8, %vm1116_vm7 }
 0x90c   : > { %v1111_v28 = vmul.f32 %v1401_v26, %v1110_v27 }
 0x90e   : > { %v1112_v29 = vmul.f32 0.5, %v1111_v28 }
 0x910   : > { %v1113_v30 = vsub.f32 1.5, %v1112_v29 }
 0x912   : > { %v1114_v31 = vmul.f32 %v1401_v26, %v1113_v30 }
 0x914   : > { %v1118_v32 = vsel %vm1117_vm9, %v1401_v26, %v1114_v31 }
 0x915   : > { %v1119_v34 = vmul.f32 %v1118_v32, %v1102_v20 }
 0x917   : > { %v1123_v36 = vmul.f32 %v1376_v33, %v1119_v34 }
 0x919   : > { %v1127_v6 = vadd.f32 %v1377_v35, %v1123_v36 }
 0x91b   : > { %1128 = vst.msk [vmem:[%s540_s23] sm:$0xff] %vm551_vm0, %v1127_v6 }
 0x91c   : > { %1489 = shalt.err (!%p1486_p13)
}
 0x91d   : > { %1289 = dma.vmem_to_hbm [thread:$0]  (%p1684_p9), %s1144_s15, 128, %s1146_s17, %s1130_s26  }
 0x91e PF: > { %s1949_s14 = sld [smem:[#allocation11_spill]]  ;;  %p1299_p0 = pnand %p1252_p12, %p1691_p11 }
 0x920   : > { %p1300_p1 = pneg %p1299_p0 }
 0x924   : > { %s1157_s12 = sand.u32 1, %s1949_s14  }
 0x925   : > { %s1158_s16 = scalar_lea.sflag [#allocation4], %s1157_s12 }
 0x926   : > { %1523 = dma.done.wait (%p1300_p1), %s1158_s16, 128  }
 0x927   : > { %1525 = vsyncadd (%p1300_p1), %s1158_s16, 4294967168  ;;  %s33_s18 = sadd.s32 1, %s1548_s18   ;;  %s1951_s23 = sld [smem:[#allocation12_spill]] }
 0x928   : > { %p30_p2 = scmp.ge.s32.totalorder %s33_s18, 4   ;;  %s1952_s15 = sld [smem:[#allocation17_spill]] }
 0x929   : > { %s1953_s16 = sld [smem:[#allocation14_spill]]  ;;  %s1955_s29 = smov %s1532_s30 }
 0x92a   : > { %s1954_s17 = sld [smem:[#allocation15_spill]]  ;;  %32 = sbr.rel (!%p30_p2) target bundleno = 12 (0xc), region = 134 }
 0x92d   : > { %s1956_s30 = smov %s1951_s23 }
 0x92f   :  { %1164 = vsyncpa [#allocation3], 1 }
 0x930   :  { %1166 = vsyncpa [#allocation3 + $0x1], 1 }
 0x931   :  { %1167 = vsyncpa [#allocation6], 1 }
 0x932   :  { %1169 = vsyncpa [#allocation6 + $0x1], 1 }
 0x933   :  { %1170 = vsyncpa [#allocation4], 1 }
 0x934   :  { %1172 = vsyncpa [#allocation4 + $0x1], 1 }

</bundles_post_ra>
